<compile_context>
chip_gen: v7x
topology: tpu7x:2x2x1
jax: 0.10.0
libtpu: 0.0.40
codegen_flags: <defaults>
</compile_context>

<pallas_src>
import jax
import jax.numpy as jnp
from jax.experimental import pallas as pl
from jax.experimental.pallas import tpu as pltpu


def _round_up(x, m):
    return (x + m - 1) // m * m


def _cdiv(a, b):
    return (a + b - 1) // b


def _pick_tm(B):
    """Batch tile: 16-aligned for tiny batches, otherwise 128-aligned balanced tiles,
    with >= 2 tiles when B >= 256 so the second v7x TensorCore is not idle."""
    if B <= 128:
        return max(16, _round_up(B, 16))
    n_tiles = _cdiv(B, 512)
    if B >= 256:
        n_tiles = max(2, n_tiles)
    return min(512, _round_up(_cdiv(B, n_tiles), 128))


def _pick_tk(H, w_itemsize, vmem_cap):
    """Hidden (intermediate) chunk: stream W1/W2 only when resident full weights
    (double-buffer worst case) would eat too much of this chip's VMEM."""
    if H % 128 == 0 and 2 * H * H * w_itemsize > vmem_cap // 4:
        for tk in (512, 256, 128):
            if H % tk == 0:
                return tk
    return H


def _vmem_budget(tm, tk, H, L_pad, x_isz, w_isz, o_isz):
    """Working-set estimate (double-buffered pipelined operands + scratch + f32 temporaries)."""
    return (2 * tm * H * x_isz          # x tile (double-buffered, original dtype)
            + 2 * H * tk * w_isz        # W1 column block
            + 2 * tk * 4                # dense bias chunk (f32)
            + 2 * tk * L_pad * w_isz    # W2 row block
            + 2 * L_pad * 4             # out_proj bias (f32)
            + 2 * tm * L_pad * o_isz    # output tile
            + tm * L_pad * 4            # f32 accumulator scratch
            + 2 * tm * tk * 4           # in-kernel f32 h chunk (+ headroom)
            + tm * H * w_isz)           # in-kernel cast of the x tile to compute dtype


def _classification_head_kernel(x_ref, w1_ref, b1_ref, w2_ref, b2_ref, o_ref, acc_ref):
    k = pl.program_id(1)

    @pl.when(k == 0)
    def _():
        acc_ref[...] = jnp.zeros_like(acc_ref)

    # dropout(x) -> identity at inference
    # TODO(synk): training-mode dropout would need pltpu.prng_* masking; inference semantics only.
    x = x_ref[...].astype(w1_ref.dtype)                 # cast in-kernel (no wrapper-side copy of x)
    h = jnp.dot(x, w1_ref[...], preferred_element_type=jnp.float32) + b1_ref[...]
    h = jnp.tanh(h)                                     # f32 activations (EUP)
    # second dropout -> identity at inference
    acc_ref[...] += jnp.dot(h.astype(w2_ref.dtype), w2_ref[...],
                            preferred_element_type=jnp.float32)

    @pl.when(k == pl.num_programs(1) - 1)
    def _():
        o_ref[...] = (acc_ref[...] + b2_ref[...]).astype(o_ref.dtype)


def prepare_classification_head_params(w_dense, b_dense, w_out, b_out, *,
                                        compute_dtype=jnp.bfloat16):
    """One-time parameter prep (hoisted out of the per-call hot path).

    w_dense: [H, H] and w_out: [L, H] in PyTorch nn.Linear layout ([out_features, in_features]).
    Returns kernel-ready arrays: [in, out]-layout weights in compute_dtype, f32 biases,
    num_labels lane-padded to a multiple of 128.
    """
    H = w_dense.shape[1]
    L = w_out.shape[0]
    L_pad = _round_up(L, 128)
    cdt = jnp.dtype(compute_dtype)

    w1 = jnp.asarray(w_dense).T.astype(cdt)                       # [H, H]
    b1 = jnp.asarray(b_dense).astype(jnp.float32).reshape(1, H)
    w2 = jnp.asarray(w_out).T.astype(cdt)                         # [H, L]
    b2 = jnp.asarray(b_out).astype(jnp.float32)
    if L_pad != L:
        w2 = jnp.pad(w2, ((0, 0), (0, L_pad - L)))
        b2 = jnp.pad(b2, (0, L_pad - L))
    b2 = b2.reshape(1, L_pad)
    return {"w1": w1, "b1": b1, "w2": w2, "b2": b2, "num_labels": L}


def classification_head_apply(x, params):
    """x: [B, H] (any float dtype) -> [B, num_labels] in x.dtype."""
    w1, b1, w2, b2 = params["w1"], params["b1"], params["w2"], params["b2"]
    L = params["num_labels"]
    B, H = x.shape
    L_pad = w2.shape[1]
    out_dtype = x.dtype

    x_isz = jnp.dtype(x.dtype).itemsize
    w_isz = jnp.dtype(w1.dtype).itemsize
    o_isz = jnp.dtype(out_dtype).itemsize

    # chip-aware VMEM capacity (v5e/v6e: 128 MiB, v7x: 64 MiB per core)
    try:
        vmem_cap = int(pltpu.get_tpu_info().vmem_capacity_bytes * 0.85)
    except Exception:
        vmem_cap = 54 * 1024 * 1024   # conservative default (covers v7x)

    tk = _pick_tk(H, w_isz, vmem_cap)
    tm = _pick_tm(B)

    # shrink tiles until the working set fits this chip's VMEM
    while _vmem_budget(tm, tk, H, L_pad, x_isz, w_isz, o_isz) > vmem_cap:
        if tm > 128:
            tm = max(128, _round_up(tm // 2, 128))
        elif tk > 128 and H % (tk // 2) == 0 and (tk // 2) % 128 == 0:
            tk //= 2
        else:
            break

    nb = _cdiv(B, tm)     # ragged tail handled by Pallas' padded last block
    nk = H // tk

    vmem_limit = int(min(vmem_cap,
                         max(32 * 1024 * 1024,
                             2 * _vmem_budget(tm, tk, H, L_pad, x_isz, w_isz, o_isz))))

    cost = pl.CostEstimate(
        flops=2 * B * H * (H + L_pad),
        transcendentals=B * H,
        bytes_accessed=int(B * H * x_isz
                           + nb * (w1.size + w2.size) * w_isz
                           + (b1.size + b2.size) * 4
                           + B * L_pad * o_isz),
    )

    out = pl.pallas_call(
        _classification_head_kernel,
        out_shape=jax.ShapeDtypeStruct((B, L_pad), out_dtype),
        grid_spec=pltpu.PrefetchScalarGridSpec(
            num_scalar_prefetch=0,
            grid=(nb, nk),
            in_specs=[
                pl.BlockSpec((tm, H), lambda i, k: (i, 0)),        # x tile (resident across k)
                pl.BlockSpec((H, tk), lambda i, k: (0, k)),        # dense weight column block
                pl.BlockSpec((1, tk), lambda i, k: (0, k)),        # dense bias chunk
                pl.BlockSpec((tk, L_pad), lambda i, k: (k, 0)),    # out_proj weight row block
                pl.BlockSpec((1, L_pad), lambda i, k: (0, 0)),     # out_proj bias
            ],
            out_specs=pl.BlockSpec((tm, L_pad), lambda i, k: (i, 0)),
            scratch_shapes=[pltpu.VMEM((tm, L_pad), jnp.float32)],
        ),
        compiler_params=pltpu.CompilerParams(
            dimension_semantics=("parallel", "arbitrary"),
            vmem_limit_bytes=vmem_limit,
        ),
        cost_estimate=cost,
    )(x, w1, b1, w2, b2)

    return out[:, :L]


def classification_head(x, w_dense, b_dense, w_out, b_out, *, compute_dtype=jnp.bfloat16):
    """Convenience wrapper: PyTorch-layout params ([out, in] weights) -> head output.
    For production use, call prepare_classification_head_params() once at model load and
    reuse the returned params with classification_head_apply()."""
    params = prepare_classification_head_params(
        w_dense, b_dense, w_out, b_out, compute_dtype=compute_dtype)
    return classification_head_apply(x, params)


if __name__ == "__main__":
    # Small config: batch=16, hidden=32, num_labels=4
    B, H, L = 16, 32, 4
    key = jax.random.PRNGKey(0)
    kx, kw1, kb1, kw2, kb2 = jax.random.split(key, 5)

    x = jax.random.normal(kx, (B, H), dtype=jnp.float32)
    # PyTorch nn.Linear layout: dense [H, H], out_proj [L, H]   (weight[out, in])
    w_dense = jax.random.normal(kw1, (H, H), dtype=jnp.float32) * 0.05
    b_dense = jax.random.normal(kb1, (H,), dtype=jnp.float32) * 0.05
    w_out = jax.random.normal(kw2, (L, H), dtype=jnp.float32) * 0.05
    b_out = jax.random.normal(kb2, (L,), dtype=jnp.float32) * 0.05

    # pure-JAX reference (dropout is identity at inference)
    ref = jnp.tanh(x @ w_dense.T + b_dense) @ w_out.T + b_out

    # f32 operand path: tight numerical check
    out_f32 = classification_head(x, w_dense, b_dense, w_out, b_out,
                                  compute_dtype=jnp.float32)
    out_f32 = jax.block_until_ready(out_f32)
    assert out_f32.shape == (B, L)
    assert jnp.allclose(out_f32, ref, atol=1e-5, rtol=1e-5)

    # default path (bf16 MXU operands, f32 accumulation): looser check
    # NOTE: intentional accuracy trade vs a pure-f32 PyTorch head.
    out_bf16 = classification_head(x, w_dense, b_dense, w_out, b_out)
    out_bf16 = jax.block_until_ready(out_bf16)
    assert out_bf16.shape == (B, L)
    assert jnp.allclose(out_bf16, ref, atol=3e-2, rtol=3e-2)

    print("KERNEL_OK")
</pallas_src>

<mosaic_0001>
module attributes {stable_mosaic.version = 11 : i64} {
  func.func @_classification_head_kernel(%arg0: i32, %arg1: i32, %arg2: memref<16x32xf32, #tpu.memory_space<vmem>>, %arg3: memref<32x32xf32, #tpu.memory_space<vmem>>, %arg4: memref<1x32xf32, #tpu.memory_space<vmem>>, %arg5: memref<32x128xf32, #tpu.memory_space<vmem>>, %arg6: memref<1x128xf32, #tpu.memory_space<vmem>>, %arg7: memref<16x128xf32, #tpu.memory_space<vmem>>, %arg8: memref<16x128xf32, #tpu.memory_space<vmem>>) attributes {dimension_semantics = [#tpu.dimension_semantics<parallel>, #tpu.dimension_semantics<arbitrary>], iteration_bounds = array<i64: 1, 1>, scalar_prefetch = 0 : i64, scratch_operands = 1 : i64, tpu.core_type = #tpu.core_type<tc>, window_params = [{transform_indices = @transform_0, window_bounds = array<i64: 16, 32>}, {transform_indices = @transform_1, window_bounds = array<i64: 32, 32>}, {transform_indices = @transform_2, window_bounds = array<i64: 1, 32>}, {transform_indices = @transform_3, window_bounds = array<i64: 32, 128>}, {pipeline_mode = #tpu.pipeline_mode<synchronous>, transform_indices = @transform_4, window_bounds = array<i64: 1, 128>}, {transform_indices = @transform_5, window_bounds = array<i64: 16, 128>}]} {
    %c0_i32 = arith.constant 0 : i32
    %0 = arith.cmpi eq, %arg1, %c0_i32 : i32
    %1 = arith.extui %0 : i1 to i32
    %c0_i32_0 = arith.constant 0 : i32
    %2 = arith.cmpi ne, %1, %c0_i32_0 : i32
    scf.if %2 {
      %cst_15 = arith.constant 0.000000e+00 : f32
      %18 = vector.broadcast %cst_15 : f32 to vector<16x128xf32>
      %c0_16 = arith.constant 0 : index
      %c0_17 = arith.constant 0 : index
      %19 = vector.load %arg8[%c0_16, %c0_17] : memref<16x128xf32, #tpu.memory_space<vmem>>, vector<16x128xf32>
      tpu.vector_store %arg8[%c0_16, %c0_17], %18 {strides = array<i32>} : memref<16x128xf32, #tpu.memory_space<vmem>>, vector<16x128xf32>,
    } else {
    }
    %c0 = arith.constant 0 : index
    %c0_1 = arith.constant 0 : index
    %3 = vector.load %arg2[%c0, %c0_1] : memref<16x32xf32, #tpu.memory_space<vmem>>, vector<16x32xf32>
    %c0_2 = arith.constant 0 : index
    %c0_3 = arith.constant 0 : index
    %4 = vector.load %arg3[%c0_2, %c0_3] : memref<32x32xf32, #tpu.memory_space<vmem>>, vector<32x32xf32>
    %cst = arith.constant dense<0.000000e+00> : vector<16x32xf32>
    %5 = tpu.matmul %3, %4, %cst {dimension_numbers = #tpu.dot_dimension_numbers<[1], [0], [0], [1], [0, 0, 1, 1], [], []>} : vector<16x32xf32>, vector<32x32xf32>, vector<16x32xf32> -> vector<16x32xf32>
    %c0_4 = arith.constant 0 : index
    %c0_5 = arith.constant 0 : index
    %6 = vector.load %arg4[%c0_4, %c0_5] : memref<1x32xf32, #tpu.memory_space<vmem>>, vector<1x32xf32>
    %7 = vector.broadcast %6 : vector<1x32xf32> to vector<16x32xf32>
    %8 = arith.addf %5, %7 : vector<16x32xf32>
    %9 = math.tanh %8 : vector<16x32xf32>
    %c0_6 = arith.constant 0 : index
    %c0_7 = arith.constant 0 : index
    %10 = vector.load %arg8[%c0_6, %c0_7] : memref<16x128xf32, #tpu.memory_space<vmem>>, vector<16x128xf32>
    %c0_8 = arith.constant 0 : index
    %c0_9 = arith.constant 0 : index
    %11 = vector.load %arg5[%c0_8, %c0_9] : memref<32x128xf32, #tpu.memory_space<vmem>>, vector<32x128xf32>
    %cst_10 = arith.constant dense<0.000000e+00> : vector<16x128xf32>
    %12 = tpu.matmul %9, %11, %cst_10 {dimension_numbers = #tpu.dot_dimension_numbers<[1], [0], [0], [1], [0, 0, 1, 1], [], []>} : vector<16x32xf32>, vector<32x128xf32>, vector<16x128xf32> -> vector<16x128xf32>
    %13 = arith.addf %10, %12 : vector<16x128xf32>
    %c0_11 = arith.constant 0 : index
    %c0_12 = arith.constant 0 : index
    %14 = vector.load %arg8[%c0_11, %c0_12] : memref<16x128xf32, #tpu.memory_space<vmem>>, vector<16x128xf32>
    tpu.vector_store %arg8[%c0_11, %c0_12], %13 {strides = array<i32>} : memref<16x128xf32, #tpu.memory_space<vmem>>, vector<16x128xf32>,
    %c0_i32_13 = arith.constant 0 : i32
    %15 = arith.cmpi eq, %arg1, %c0_i32_13 : i32
    %16 = arith.extui %15 : i1 to i32
    %c0_i32_14 = arith.constant 0 : i32
    %17 = arith.cmpi ne, %16, %c0_i32_14 : i32
    scf.if %17 {
      %c0_15 = arith.constant 0 : index
      %c0_16 = arith.constant 0 : index
      %18 = vector.load %arg8[%c0_15, %c0_16] : memref<16x128xf32, #tpu.memory_space<vmem>>, vector<16x128xf32>
      %c0_17 = arith.constant 0 : index
      %c0_18 = arith.constant 0 : index
      %19 = vector.load %arg6[%c0_17, %c0_18] : memref<1x128xf32, #tpu.memory_space<vmem>>, vector<1x128xf32>
      %20 = vector.broadcast %19 : vector<1x128xf32> to vector<16x128xf32>
      %21 = arith.addf %18, %20 : vector<16x128xf32>
      %c0_19 = arith.constant 0 : index
      %c0_20 = arith.constant 0 : index
      %22 = vector.load %arg7[%c0_19, %c0_20] : memref<16x128xf32, #tpu.memory_space<vmem>>, vector<16x128xf32>
      tpu.vector_store %arg7[%c0_19, %c0_20], %21 {strides = array<i32>} : memref<16x128xf32, #tpu.memory_space<vmem>>, vector<16x128xf32>,
    } else {
    }
    return
  }
  func.func @transform_0(%arg0: i32, %arg1: i32) -> (i32, i32) {
    %c0_i32 = arith.constant 0 : i32
    %c0_i32_0 = arith.constant 0 : i32
    return %arg0, %c0_i32 : i32, i32
  }
  func.func @transform_1(%arg0: i32, %arg1: i32) -> (i32, i32) {
    %c0_i32 = arith.constant 0 : i32
    %c0_i32_0 = arith.constant 0 : i32
    return %c0_i32, %arg1 : i32, i32
  }
  func.func @transform_2(%arg0: i32, %arg1: i32) -> (i32, i32) {
    %c0_i32 = arith.constant 0 : i32
    %c0_i32_0 = arith.constant 0 : i32
    return %c0_i32, %arg1 : i32, i32
  }
  func.func @transform_3(%arg0: i32, %arg1: i32) -> (i32, i32) {
    %c0_i32 = arith.constant 0 : i32
    %c0_i32_0 = arith.constant 0 : i32
    return %arg1, %c0_i32 : i32, i32
  }
  func.func @transform_4(%arg0: i32, %arg1: i32) -> (i32, i32) {
    %c0_i32 = arith.constant 0 : i32
    %c0_i32_0 = arith.constant 0 : i32
    %c0_i32_1 = arith.constant 0 : i32
    return %c0_i32, %c0_i32_0 : i32, i32
  }
  func.func @transform_5(%arg0: i32, %arg1: i32) -> (i32, i32) {
    %c0_i32 = arith.constant 0 : i32
    %c0_i32_0 = arith.constant 0 : i32
    return %arg0, %c0_i32 : i32, i32
  }
}

</mosaic_0001>

<bundles_post_ra>
// kernel: tpu_custom_call.1
= control target key start
LH: loop header
LB: loop body
LE: loop exit
PB: predicated region body
PF: predicated region fallthrough
CT: control target
= control target key end

     0   :  { %10 = vsyncpa [#allocation4], 0  ;;  %s563_s0 = inlined_call_operand.hbm [shape: f32[16,32], index: 0, kind: input, shape index: {}]   ;;  %s564_s1 = inlined_call_operand.hbm [shape: f32[32,32], index: 1, kind: input, shape index: {}]   ;;  %s565_s2 = inlined_call_operand.vmem [shape: f32[1,32], index: 2, kind: input, shape index: {}]   ;;  %s566_s3 = inlined_call_operand.hbm [shape: f32[32,128], index: 3, kind: input, shape index: {}]   ;;  %s567_s4 = inlined_call_operand.vmem [shape: f32[1,128], index: 4, kind: input, shape index: {}]   ;;  %s568_s5 = inlined_call_operand.hbm [shape: f32[16,128], index: 5, kind: output, shape index: {}]  }
   0x1   :  { %11 = vsyncpa [#allocation7], 0 }
   0x2   :  { %12 = vsyncpa [#allocation5], 0  ;;  %s450_s18 = smov [#allocation6]   ;;  %s451_s20 = smov [#allocation3]  }
   0x3   :  { %s30_s19 = sshll.u32 %s450_s18, 4  ;;  %s18_s21 = sshll.u32 %s451_s20, 4  ;;  %s31_s19 = int_to_ptr.vmem [resolvable:$true] %s30_s19  ;;  %s486_s21 = int_to_ptr.vmem [resolvable:$true] %s18_s21 }
   0x4   :  { %s356_s24 = scalar_lea.hbm %s564_s1, 512 }
   0x5   :  { %p357_p0 = scmp.ne.s32.totalorder %s564_s1, %s356_s24  ;;  %p360_p1 = scmp.lt.u32.totalorder %s356_s24, %s564_s1 }
   0x7   :  { %p362_p2 = pnand %p360_p1, %p357_p0 }
   0x9   :  { %365 = shalt.err (!%p362_p2)
}
   0xa   :  { %s366_s29 = scalar_lea.vmem %s31_s19, 512  ;;  %p371_p4 = scmp.lt.s32.totalorder %s31_s19, %s31_s19 }
   0xb   :  { %p367_p3 = scmp.ne.s32.totalorder %s31_s19, %s366_s29  ;;  %p372_p5 = scmp.lt.s32.totalorder %s366_s29, %s366_s29 }
   0xd   :  { %p373_p6 = por %p372_p5, %p371_p4 }
   0xf   :  { %p374_p7 = pnand %p373_p6, %p367_p3 }
  0x11   :  { %377 = shalt.err (!%p374_p7)
}
  0x12   :  { %s452_s30 = smov 128   ;;  %s453_s6 = smov 8  }
  0x13   :  { %36 = dma.hbm_to_vmem [thread:$0]  %s564_s1, 512, %s31_s19, [#allocation7], %s452_s30, %s452_s30, %s453_s6  }
  0x14   :  { %s378_s11 = scalar_lea.hbm %s563_s0, 256 }
  0x15   :  { %p379_p8 = scmp.ne.s32.totalorder %s563_s0, %s378_s11  ;;  %p382_p9 = scmp.lt.u32.totalorder %s378_s11, %s563_s0 }
  0x17   :  { %p384_p10 = pnand %p382_p9, %p379_p8 }
  0x19   :  { %387 = shalt.err (!%p384_p10)
}
  0x1a   :  { %s388_s16 = scalar_lea.vmem %s486_s21, 256  ;;  %p393_p12 = scmp.lt.s32.totalorder %s486_s21, %s486_s21 }
  0x1b   :  { %p389_p11 = scmp.ne.s32.totalorder %s486_s21, %s388_s16  ;;  %p394_p13 = scmp.lt.s32.totalorder %s388_s16, %s388_s16 }
  0x1d   :  { %p395_p0 = por %p394_p13, %p393_p12 }
  0x1f   :  { %p396_p1 = pnand %p395_p0, %p389_p11 }
  0x21   :  { %399 = shalt.err (!%p396_p1)
}
  0x22   :  { %24 = dma.hbm_to_vmem [thread:$0]  %s563_s0, 256, %s486_s21, [#allocation4], %s452_s30, %s452_s30, %s453_s6  }
  0x23   :  { %s454_s18 = smov [#allocation8]   ;;  %s400_s23 = scalar_lea.hbm %s566_s3, 512 }
  0x24   :  { %s44_s19 = sshll.u32 %s454_s18, 4  ;;  %p401_p2 = scmp.ne.s32.totalorder %s566_s3, %s400_s23  ;;  %s45_s19 = int_to_ptr.vmem [resolvable:$true] %s44_s19 }
  0x25   :  { %p404_p3 = scmp.lt.u32.totalorder %s400_s23, %s566_s3 }
  0x27   :  { %p406_p4 = pnand %p404_p3, %p401_p2 }
  0x29   :  { %409 = shalt.err (!%p406_p4)
}
  0x2a   :  { %s410_s28 = scalar_lea.vmem %s45_s19, 512  ;;  %p415_p6 = scmp.lt.s32.totalorder %s45_s19, %s45_s19 }
  0x2b   :  { %p411_p5 = scmp.ne.s32.totalorder %s45_s19, %s410_s28  ;;  %p416_p7 = scmp.lt.s32.totalorder %s410_s28, %s410_s28 }
  0x2d   :  { %p417_p8 = por %p416_p7, %p415_p6 }
  0x2f   :  { %p418_p9 = pnand %p417_p8, %p411_p5 }
  0x31   :  { %421 = shalt.err (!%p418_p9)
}
  0x32   :  { %50 = dma.hbm_to_vmem [thread:$0]  %s566_s3, 512, %s45_s19, [#allocation7], %s452_s30, %s452_s30, %s453_s6  }
  0x33   :  { %444 = dma.done.wait [#allocation4], 256  }
  0x34   :  { %445 = vsyncadd [#allocation4], 4294967040 }
  0x35   :  { %446 = dma.done.wait [#allocation7], 1024  }
  0x36   :  { %447 = vsyncadd [#allocation7], 4294966272  ;;  %vm81_vm0 = vcmask 261120   ;;  %v70_v0 = vld [vmem:[#allocation6] sm:$0xff]  ;;  %v71_v1 = vld [vmem:[#allocation6 + $0x8] sm:$0xff]  ;;  %s455_s9 = smov [#allocation9]  }
  0x37   :  { %v72_v2 = vld [vmem:[#allocation6 + $0x10] sm:$0xff]  ;;  %v330_v3 = vpack.c.bf16 %v71_v1, %v70_v0  ;;  %v73_v4 = vld [vmem:[#allocation6 + $0x18] sm:$0xff]  ;;  %v167_v8 = vld [vmem:[#allocation8] sm:$0xff]  ;;  %s277_s10 = sshll.u32 %s455_s9, 4  ;;  %s278_s10 = int_to_ptr.vmem [resolvable:$true] %s277_s10 }
  0x38   :  { %v68_v5 = vld [vmem:[#allocation3] sm:$0xff]  ;;  %v334_v6 = vpack.c.bf16 %v73_v4, %v72_v2  ;;  %v69_v7 = vld [vmem:[#allocation3 + $0x8] sm:$0xff]  ;;  %v168_v9 = vld [vmem:[#allocation8 + $0x8] sm:$0xff]  ;;  %p427_p11 = scmp.lt.s32.totalorder %s278_s10, %s278_s10 }
  0x39   :  { %316 = vmatprep.mubr.msk.f32.mxu0 %vm81_vm0, %v68_v5  ;;  %331 = vmatprep.subr.bf16.mxu0 %v330_v3  ;;  %v169_v10 = vld [vmem:[#allocation8 + $0x10] sm:$0xff]  ;;  %v338_v11 = vpack.c.bf16 %v168_v9, %v167_v8  ;;  %v170_v12 = vld [vmem:[#allocation8 + $0x18] sm:$0xff] }
  0x3a   :  { %333 = vmatpush3.bf16.msra.mxu0 %v330_v3  ;;  %v342_v13 = vpack.c.bf16 %v170_v12, %v169_v10  ;;  %v290_v14 = vld [vmem:[%s565_s2] ss:$0 sm:$0xff]  ;;  %s422_s2 = scalar_lea.vmem %s278_s10, 256 }
  0x3b   :  { %335 = vmatprep.subr.bf16.mxu0 %v334_v6  ;;  %339 = vmatprep.subr.bf16.mxu1 %v338_v11  ;;  %v295_v21 = vld [vmem:[%s567_s4] ss:$0 sm:$0xff]  ;;  %p423_p10 = scmp.ne.s32.totalorder %s278_s10, %s422_s2  ;;  %p428_p12 = scmp.lt.s32.totalorder %s422_s2, %s422_s2 }
  0x3c   :  { %341 = vmatpush3.bf16.msra.mxu1 %v338_v11 }
  0x3d   :  { %343 = vmatprep.subr.bf16.mxu1 %v342_v13  ;;  %p429_p13 = por %p428_p12, %p427_p11 }
  0x3e   :  { %337 = vmatpush3.bf16.msra.mxu0 %v334_v6 }
  0x3f   :  { %p430_p0 = pnand %p429_p13, %p423_p10 }
  0x40   :  { %345 = vmatpush3.bf16.msra.mxu1 %v342_v13 }
  0x41   :  { %317 = vmatmul.mubr.msk.f32.vlgmr.msra.gmra.mrb[0].mxu0 %vm81_vm0, %v69_v7 }
 0x114   :  { %v318_v15 = vpop.f32.mrb[0].mxu0 }
 0x115   :  { %v160_v16 = vadd.f32 %v318_v15, %v290_v14  ;;  %v154_v17 = vpop.f32.mrb[1].mxu0 }
 0x116   :  { %v155_v18 = vadd.f32 %v290_v14, %v154_v17 }
 0x118   :  { %352 = vtanh.f32 %v155_v18 }
 0x119   :  { %354 = vtanh.f32 %v160_v16 }
 0x122   :  { %v353_v19 = vpop.eup %352 }
 0x123   :  { %v355_v20 = vpop.eup %354  ;;  %327 = vmatprep.mubr.msk.f32.mxu1 %vm81_vm0, %v353_v19 }
 0x124   :  { %328 = vmatmul.mubr.msk.f32.vlgmr.msra.gmra.mrb[0].mxu1 %vm81_vm0, %v355_v20 }
 0x1f7   :  { %v329_v22 = vpop.f32.mrb[0].mxu1 }
 0x1f8   :  { %v269_v23 = vadd.f32 %v329_v22, %v295_v21  ;;  %v243_v24 = vpop.f32.mrb[1].mxu1 }
 0x1f9   :  { %v268_v25 = vadd.f32 %v295_v21, %v243_v24 }
 0x1fa   :  { %271 = vst [vmem:[#allocation9 + $0x8] sm:$0xff] %v269_v23 }
 0x1fb   :  { %270 = vst [vmem:[#allocation9] sm:$0xff] %v268_v25 }
 0x1fc   :  { %433 = shalt.err (!%p430_p0)
}
 0x1fd   :  { %s434_s4 = scalar_lea.hbm %s568_s5, 256 }
 0x1fe   :  { %p435_p1 = scmp.ne.s32.totalorder %s568_s5, %s434_s4  ;;  %p438_p2 = scmp.lt.u32.totalorder %s434_s4, %s568_s5 }
 0x200   :  { %p440_p3 = pnand %p438_p2, %p435_p1 }
 0x202   :  { %443 = shalt.err (!%p440_p3)
}
 0x203   :  { %283 = dma.vmem_to_hbm [thread:$0]  %s278_s10, 256, %s568_s5, [#allocation5], %s452_s30, %s452_s30, %s453_s6  }
 0x204   :  { %448 = dma.done.wait [#allocation5], 256  }
 0x205   :  { %449 = vsyncadd [#allocation5], 4294967040 }
 0x206   :  { %287 = vsyncpa [#allocation4], 1 }
 0x207   :  { %288 = vsyncpa [#allocation7], 1 }
 0x208   :  { %289 = vsyncpa [#allocation5], 1 }

</bundles_post_ra>
